<compile_context>
chip_gen: v7x
topology: tpu7x:2x2x1
jax: 0.10.0
libtpu: 0.0.40
codegen_flags: <defaults>
</compile_context>

<pallas_src>
import functools

import jax
import jax.numpy as jnp
from jax.experimental import pallas as pl
from jax.experimental.pallas import tpu as pltpu


def _fused_cnn_kernel(*refs, K, dil, n_layers):
    """Fused multi-layer 1-D conv ('same' padding) with ReLU between layers.

    refs = (x_ref, w0, b0, w1, b1, ..., o_ref)
      x_ref : (Bt, L, C0)         input block (compute dtype)
      w_l   : (K*C_l, C_{l+1})    conv taps, flattened (tap-major) (compute dtype)
      b_l   : (1, C_{l+1})        bias (f32)
      o_ref : (Bt, L, C_last)     output block (true width)
    """
    x_ref = refs[0]
    wb_refs = refs[1:1 + 2 * n_layers]
    o_ref = refs[1 + 2 * n_layers]

    Bt, L, C0 = x_ref.shape
    M = Bt * L
    center = (K - 1) // 2

    # Position-within-sequence for every flattened row; used to zero the taps
    # that would read across the 'same'-padding boundary (and, as a side
    # effect, any rows that the flat roll wrapped across batch boundaries).
    t_idx = jax.lax.broadcasted_iota(jnp.int32, (M, 1), 0) % L

    # Activations live as f32 values only (never round-trip to HBM).
    h = x_ref[...].reshape(M, C0).astype(jnp.float32)

    for l in range(n_layers):
        w_ref = wb_refs[2 * l]        # (K*C_in, C_out)
        b_ref = wb_refs[2 * l + 1]    # (1, C_out) f32

        # Build the K shifted taps with XLU rolls + edge masks (no pad slab).
        taps = []
        for k in range(K):
            d = (k - center) * dil    # static offset of tap k
            if d == 0:
                taps.append(h)
                continue
            v = pltpu.roll(h, shift=(-d) % M, axis=0)   # v[r] == h[r + d]
            if d > 0:
                v = jnp.where(t_idx < (L - d), v, 0.0)
            else:
                v = jnp.where(t_idx >= (-d), v, 0.0)
            taps.append(v)

        # One fused matmul per layer: contraction depth K*C_in.
        xcat = jnp.concatenate(taps, axis=-1).astype(w_ref.dtype)   # (M, K*C_in)
        acc = jnp.dot(xcat, w_ref[...], preferred_element_type=jnp.float32)
        acc = acc + b_ref[...]                                       # f32 bias

        if l < n_layers - 1:
            h = jnp.maximum(acc, 0.0)                                # ReLU
        else:
            o_ref[...] = acc.reshape(Bt, L, -1).astype(o_ref.dtype)


def _num_tensorcores():
    """Best-effort core count (megacore gating); defaults to 1 if unknown."""
    try:
        info = pltpu.get_tpu_info()
        for name in ("num_cores", "core_count", "num_tensorcores"):
            n = getattr(info, name, None)
            if n:
                return int(n)
    except Exception:
        pass
    return 1


def cnn_forward(x, params, dilation=1, compute_dtype=jnp.bfloat16,
                target_rows=4096):
    """CNN.forward, fully fused into one pallas_call.

    x: (B, L, C_in) float32.
    params: list of (w, b), w: (K, c_in, c_out), b: (1, c_out), all float32.
    Returns (B, L, out_size) in x.dtype.
    """
    B, L, C_in = x.shape
    n_layers = len(params)
    K = params[0][0].shape[0]
    assert K % 2 == 1, "'same' Conv1d here assumes an odd kernel size"

    # Rough per-row byte footprint of in-kernel values (h, taps, concat, acc);
    # bound the flattened-row tile so it stays well inside every generation's
    # scoped-VMEM limit (v5e 16 MiB default, v7x 64 MiB physical).
    chans = [C_in] + [w.shape[2] for (w, _) in params]
    row_bytes = 4 * max(chans[l] * (2 * K + 1) + chans[l + 1]
                        for l in range(n_layers))
    m_budget = max((8 * 1024 * 1024) // row_bytes, 8)
    rows = max(min(target_rows, m_budget), L)          # at least one batch row
    bt = max(1, min(B, rows // L))

    # Keep >= 2 grid steps only when the chip actually has >1 TensorCore
    # (v7x megacore); on single-TC chips splitting just adds per-step overhead.
    if _num_tensorcores() > 1 and B >= 2 and -(-B // bt) < 2:
        bt = -(-B // 2)
    grid = (-(-B // bt),)                               # ragged last tile OK

    x_c = x.astype(compute_dtype)
    inputs = [x_c]
    in_specs = [pl.BlockSpec((bt, L, C_in), lambda i: (i, 0, 0))]
    for (w, b) in params:
        kk, ci, co = w.shape
        w2 = w.reshape(kk * ci, co).astype(compute_dtype)   # (K*C_in, C_out)
        b2 = b.reshape(1, co).astype(jnp.float32)
        inputs += [w2, b2]
        # Whole-tensor blocks with constant index_maps: DMA'd once, reused by
        # every grid step.
        in_specs.append(pl.BlockSpec(w2.shape, lambda i: (0, 0)))
        in_specs.append(pl.BlockSpec(b2.shape, lambda i: (0, 0)))

    c_last = params[-1][0].shape[2]
    kernel = functools.partial(_fused_cnn_kernel, K=K, dil=dilation,
                               n_layers=n_layers)
    return pl.pallas_call(
        kernel,
        out_shape=jax.ShapeDtypeStruct((B, L, c_last), x.dtype),
        grid=grid,
        in_specs=in_specs,
        out_specs=pl.BlockSpec((bt, L, c_last), lambda i: (i, 0, 0)),
        compiler_params=pltpu.CompilerParams(
            dimension_semantics=("parallel",),
            vmem_limit_bytes=32 * 1024 * 1024,
        ),
    )(*inputs)


def init_params(key, features, kernel_size):
    """Deterministic Conv1d params per layer; (K, C_in, C_out) + (1, C_out)."""
    params = []
    for c_in, c_out in zip(features[:-1], features[1:]):
        key, kw, kb = jax.random.split(key, 3)
        bound = 1.0 / jnp.sqrt(c_in * kernel_size)
        w = jax.random.uniform(kw, (kernel_size, c_in, c_out), jnp.float32,
                               -bound, bound)
        b = jax.random.uniform(kb, (1, c_out), jnp.float32, -bound, bound)
        params.append((w, b))
    return params


def _conv_ref(x, w, b, relu, dilation=1):
    """Pure-JAX reference for one layer (lax conv, NCW like PyTorch)."""
    lhs = jnp.transpose(x, (0, 2, 1))              # (B, C_in, L)
    rhs = jnp.transpose(w, (2, 1, 0))              # (C_out, C_in, K)
    out = jax.lax.conv_general_dilated(
        lhs, rhs, window_strides=(1,), padding="SAME",
        rhs_dilation=(dilation,),
        dimension_numbers=("NCW", "OIW", "NCW"))
    out = out + b.reshape(1, -1, 1)
    out = jnp.transpose(out, (0, 2, 1))            # (B, L, C_out)
    return jnp.maximum(out, 0.0) if relu else out


def cnn_forward_ref(x, params, dilation=1):
    n = len(params)
    for i, (w, b) in enumerate(params):
        x = _conv_ref(x, w, b, relu=(i < n - 1), dilation=dilation)
    return x


if __name__ == "__main__":
    # Module config (small): num_embeddings=8, hidden_sizes=[32], out_size=4,
    # kernel_sizes=[3], conv_bias=True, pooling_kernel_size=None, dilation=1.
    num_embeddings = 8
    hidden_sizes = [32]
    out_size = 4
    kernel_size = 3
    features = [num_embeddings] + hidden_sizes + [out_size]

    key = jax.random.PRNGKey(0)
    key, kx = jax.random.split(key)
    B, L = 2, 16
    # CNN.forward consumes a float tensor whose channel dim == num_embeddings.
    x = jax.random.normal(kx, (B, L, num_embeddings), jnp.float32)
    params = init_params(key, features, kernel_size)
    ref = cnn_forward_ref(x, params, dilation=1)

    # Primary (perf) path: bf16 inputs/weights, f32 accumulation.
    out_bf = jax.block_until_ready(
        cnn_forward(x, params, dilation=1, compute_dtype=jnp.bfloat16))
    assert out_bf.shape == (B, L, out_size)
    assert jnp.allclose(out_bf, ref, atol=5e-2, rtol=5e-2), \
        float(jnp.max(jnp.abs(out_bf - ref)))

    # Exactness path: f32 end-to-end must match the lax reference tightly.
    out_f32 = jax.block_until_ready(
        cnn_forward(x, params, dilation=1, compute_dtype=jnp.float32))
    assert jnp.allclose(out_f32, ref, atol=1e-4, rtol=1e-4), \
        float(jnp.max(jnp.abs(out_f32 - ref)))

    # Multi-step grid + ragged last tile + dilation=2, f32 exactness.
    key, kx2 = jax.random.split(key)
    x2 = jax.random.normal(kx2, (3, L, num_embeddings), jnp.float32)
    out2 = jax.block_until_ready(
        cnn_forward(x2, params, dilation=2, compute_dtype=jnp.float32,
                    target_rows=32))
    ref2 = cnn_forward_ref(x2, params, dilation=2)
    assert jnp.allclose(out2, ref2, atol=1e-4, rtol=1e-4), \
        float(jnp.max(jnp.abs(out2 - ref2)))

    print("KERNEL_OK")
</pallas_src>

<mosaic_0001>
module attributes {stable_mosaic.version = 11 : i64} {
  func.func @_fused_cnn_kernel(%arg0: i32, %arg1: memref<2x16x8xbf16, #tpu.memory_space<vmem>>, %arg2: memref<24x32xbf16, #tpu.memory_space<vmem>>, %arg3: memref<1x32xf32, #tpu.memory_space<vmem>>, %arg4: memref<96x4xbf16, #tpu.memory_space<vmem>>, %arg5: memref<1x4xf32, #tpu.memory_space<vmem>>, %arg6: memref<2x16x4xf32, #tpu.memory_space<vmem>>) attributes {dimension_semantics = [#tpu.dimension_semantics<parallel>], iteration_bounds = array<i64: 1>, scalar_prefetch = 0 : i64, scratch_operands = 0 : i64, tpu.core_type = #tpu.core_type<tc>, window_params = [{transform_indices = @transform_0, window_bounds = array<i64: 2, 16, 8>}, {pipeline_mode = #tpu.pipeline_mode<synchronous>, transform_indices = @transform_1, window_bounds = array<i64: 24, 32>}, {pipeline_mode = #tpu.pipeline_mode<synchronous>, transform_indices = @transform_2, window_bounds = array<i64: 1, 32>}, {pipeline_mode = #tpu.pipeline_mode<synchronous>, transform_indices = @transform_3, window_bounds = array<i64: 96, 4>}, {pipeline_mode = #tpu.pipeline_mode<synchronous>, transform_indices = @transform_4, window_bounds = array<i64: 1, 4>}, {transform_indices = @transform_5, window_bounds = array<i64: 2, 16, 4>}]} {
    %0 = tpu.iota {dimensions = array<i32: 0>} : vector<32x1xi32>
    %c16_i32 = arith.constant 16 : i32
    %c0_i32 = arith.constant 0 : i32
    %1 = arith.cmpi eq, %c16_i32, %c0_i32 : i32
    %c1_i32 = arith.constant 1 : i32
    %2 = arith.select %1, %c1_i32, %c16_i32 : i32
    %3 = vector.broadcast %2 : i32 to vector<32x1xi32>
    %4 = arith.remsi %0, %3 : vector<32x1xi32>
    %c0_i32_0 = arith.constant 0 : i32
    %5 = vector.broadcast %c0_i32_0 : i32 to vector<32x1xi32>
    %6 = arith.cmpi ne, %4, %5 : vector<32x1xi32>
    %c0_i32_1 = arith.constant 0 : i32
    %7 = vector.broadcast %c0_i32_1 : i32 to vector<32x1xi32>
    %8 = arith.cmpi slt, %4, %7 : vector<32x1xi32>
    %c0_i32_2 = arith.constant 0 : i32
    %9 = arith.cmpi slt, %2, %c0_i32_2 : i32
    %10 = vector.broadcast %9 : i1 to vector<32x1xi1>
    %11 = vector.broadcast %10 : vector<32x1xi1> to vector<32x1xi1>
    %12 = arith.xori %8, %11 : vector<32x1xi1>
    %13 = arith.andi %12, %6 : vector<32x1xi1>
    %14 = vector.broadcast %2 : i32 to vector<32x1xi32>
    %15 = arith.addi %4, %14 : vector<32x1xi32>
    %16 = arith.select %13, %15, %4 : vector<32x1xi1>, vector<32x1xi32>
    %c0 = arith.constant 0 : index
    %c0_3 = arith.constant 0 : index
    %c0_4 = arith.constant 0 : index
    %17 = vector.load %arg1[%c0, %c0_3, %c0_4] : memref<2x16x8xbf16, #tpu.memory_space<vmem>>, vector<2x16x8xbf16>
    %18 = vector.shape_cast %17 : vector<2x16x8xbf16> to vector<32x8xbf16>
    %19 = arith.extf %18 : vector<32x8xbf16> to vector<32x8xf32>
    %c1_i32_5 = arith.constant 1 : i32
    %20 = tpu.dynamic_rotate %19 by %c1_i32_5 dim 0 : vector<32x8xf32>, i32 -> vector<32x8xf32>
    %c1_i32_6 = arith.constant 1 : i32
    %21 = vector.broadcast %c1_i32_6 : i32 to vector<32x1xi32>
    %22 = arith.cmpi sge, %16, %21 : vector<32x1xi32>
    %cst = arith.constant 0.000000e+00 : f32
    %23 = vector.shape_cast %22 : vector<32x1xi1> to vector<32x1xi1>
    %24 = vector.broadcast %23 : vector<32x1xi1> to vector<32x8xi1>
    %25 = vector.broadcast %cst : f32 to vector<32x8xf32>
    %26 = arith.select %24, %20, %25 : vector<32x8xi1>, vector<32x8xf32>
    %c31_i32 = arith.constant 31 : i32
    %27 = tpu.dynamic_rotate %19 by %c31_i32 dim 0 : vector<32x8xf32>, i32 -> vector<32x8xf32>
    %c15_i32 = arith.constant 15 : i32
    %28 = vector.broadcast %c15_i32 : i32 to vector<32x1xi32>
    %29 = arith.cmpi slt, %16, %28 : vector<32x1xi32>
    %cst_7 = arith.constant 0.000000e+00 : f32
    %30 = vector.shape_cast %29 : vector<32x1xi1> to vector<32x1xi1>
    %31 = vector.broadcast %30 : vector<32x1xi1> to vector<32x8xi1>
    %32 = vector.broadcast %cst_7 : f32 to vector<32x8xf32>
    %33 = arith.select %31, %27, %32 : vector<32x8xi1>, vector<32x8xf32>
    %34 = tpu.concatenate %26, %19, %33 in 1 : vector<32x8xf32>, vector<32x8xf32>, vector<32x8xf32> -> vector<32x24xf32>
    %35 = arith.truncf %34 : vector<32x24xf32> to vector<32x24xbf16>
    %c0_8 = arith.constant 0 : index
    %c0_9 = arith.constant 0 : index
    %36 = vector.load %arg2[%c0_8, %c0_9] : memref<24x32xbf16, #tpu.memory_space<vmem>>, vector<24x32xbf16>
    %cst_10 = arith.constant dense<0.000000e+00> : vector<32x32xf32>
    %37 = tpu.matmul %35, %36, %cst_10 {dimension_numbers = #tpu.dot_dimension_numbers<[1], [0], [0], [1], [0, 0, 1, 1], [], []>} : vector<32x24xbf16>, vector<24x32xbf16>, vector<32x32xf32> -> vector<32x32xf32>
    %c0_11 = arith.constant 0 : index
    %c0_12 = arith.constant 0 : index
    %38 = vector.load %arg3[%c0_11, %c0_12] : memref<1x32xf32, #tpu.memory_space<vmem>>, vector<1x32xf32>
    %39 = vector.broadcast %38 : vector<1x32xf32> to vector<32x32xf32>
    %40 = arith.addf %37, %39 : vector<32x32xf32>
    %cst_13 = arith.constant 0.000000e+00 : f32
    %41 = vector.broadcast %cst_13 : f32 to vector<32x32xf32>
    %42 = arith.maximumf %40, %41 : vector<32x32xf32>
    %c1_i32_14 = arith.constant 1 : i32
    %43 = tpu.dynamic_rotate %42 by %c1_i32_14 dim 0 : vector<32x32xf32>, i32 -> vector<32x32xf32>
    %c1_i32_15 = arith.constant 1 : i32
    %44 = vector.broadcast %c1_i32_15 : i32 to vector<32x1xi32>
    %45 = arith.cmpi sge, %16, %44 : vector<32x1xi32>
    %cst_16 = arith.constant 0.000000e+00 : f32
    %46 = vector.shape_cast %45 : vector<32x1xi1> to vector<32x1xi1>
    %47 = vector.broadcast %46 : vector<32x1xi1> to vector<32x32xi1>
    %48 = vector.broadcast %cst_16 : f32 to vector<32x32xf32>
    %49 = arith.select %47, %43, %48 : vector<32x32xi1>, vector<32x32xf32>
    %c31_i32_17 = arith.constant 31 : i32
    %50 = tpu.dynamic_rotate %42 by %c31_i32_17 dim 0 : vector<32x32xf32>, i32 -> vector<32x32xf32>
    %c15_i32_18 = arith.constant 15 : i32
    %51 = vector.broadcast %c15_i32_18 : i32 to vector<32x1xi32>
    %52 = arith.cmpi slt, %16, %51 : vector<32x1xi32>
    %cst_19 = arith.constant 0.000000e+00 : f32
    %53 = vector.shape_cast %52 : vector<32x1xi1> to vector<32x1xi1>
    %54 = vector.broadcast %53 : vector<32x1xi1> to vector<32x32xi1>
    %55 = vector.broadcast %cst_19 : f32 to vector<32x32xf32>
    %56 = arith.select %54, %50, %55 : vector<32x32xi1>, vector<32x32xf32>
    %57 = tpu.concatenate %49, %42, %56 in 1 : vector<32x32xf32>, vector<32x32xf32>, vector<32x32xf32> -> vector<32x96xf32>
    %58 = arith.truncf %57 : vector<32x96xf32> to vector<32x96xbf16>
    %c0_20 = arith.constant 0 : index
    %c0_21 = arith.constant 0 : index
    %59 = vector.load %arg4[%c0_20, %c0_21] : memref<96x4xbf16, #tpu.memory_space<vmem>>, vector<96x4xbf16>
    %cst_22 = arith.constant dense<0.000000e+00> : vector<32x4xf32>
    %60 = tpu.matmul %58, %59, %cst_22 {dimension_numbers = #tpu.dot_dimension_numbers<[1], [0], [0], [1], [0, 0, 1, 1], [], []>} : vector<32x96xbf16>, vector<96x4xbf16>, vector<32x4xf32> -> vector<32x4xf32>
    %c0_23 = arith.constant 0 : index
    %c0_24 = arith.constant 0 : index
    %61 = vector.load %arg5[%c0_23, %c0_24] : memref<1x4xf32, #tpu.memory_space<vmem>>, vector<1x4xf32>
    %62 = vector.broadcast %61 : vector<1x4xf32> to vector<32x4xf32>
    %63 = arith.addf %60, %62 : vector<32x4xf32>
    %64 = vector.shape_cast %63 : vector<32x4xf32> to vector<2x16x4xf32>
    %c0_25 = arith.constant 0 : index
    %c0_26 = arith.constant 0 : index
    %c0_27 = arith.constant 0 : index
    %65 = vector.load %arg6[%c0_25, %c0_26, %c0_27] : memref<2x16x4xf32, #tpu.memory_space<vmem>>, vector<2x16x4xf32>
    tpu.vector_store %arg6[%c0_25, %c0_26, %c0_27], %64 {strides = array<i32>} : memref<2x16x4xf32, #tpu.memory_space<vmem>>, vector<2x16x4xf32>,
    return
  }
  func.func @transform_0(%arg0: i32) -> (i32, i32, i32) {
    %c0_i32 = arith.constant 0 : i32
    %c0_i32_0 = arith.constant 0 : i32
    %c0_i32_1 = arith.constant 0 : i32
    return %arg0, %c0_i32, %c0_i32_0 : i32, i32, i32
  }
  func.func @transform_1(%arg0: i32) -> (i32, i32) {
    %c0_i32 = arith.constant 0 : i32
    %c0_i32_0 = arith.constant 0 : i32
    %c0_i32_1 = arith.constant 0 : i32
    return %c0_i32, %c0_i32_0 : i32, i32
  }
  func.func @transform_2(%arg0: i32) -> (i32, i32) {
    %c0_i32 = arith.constant 0 : i32
    %c0_i32_0 = arith.constant 0 : i32
    %c0_i32_1 = arith.constant 0 : i32
    return %c0_i32, %c0_i32_0 : i32, i32
  }
  func.func @transform_3(%arg0: i32) -> (i32, i32) {
    %c0_i32 = arith.constant 0 : i32
    %c0_i32_0 = arith.constant 0 : i32
    %c0_i32_1 = arith.constant 0 : i32
    return %c0_i32, %c0_i32_0 : i32, i32
  }
  func.func @transform_4(%arg0: i32) -> (i32, i32) {
    %c0_i32 = arith.constant 0 : i32
    %c0_i32_0 = arith.constant 0 : i32
    %c0_i32_1 = arith.constant 0 : i32
    return %c0_i32, %c0_i32_0 : i32, i32
  }
  func.func @transform_5(%arg0: i32) -> (i32, i32, i32) {
    %c0_i32 = arith.constant 0 : i32
    %c0_i32_0 = arith.constant 0 : i32
    %c0_i32_1 = arith.constant 0 : i32
    return %arg0, %c0_i32, %c0_i32_0 : i32, i32, i32
  }
}

</mosaic_0001>

<bundles_post_ra>
// kernel: tpu_custom_call.1
= control target key start
LH: loop header
LB: loop body
LE: loop exit
PB: predicated region body
PF: predicated region fallthrough
CT: control target
= control target key end

     0   :  { %v21_v0 = vlaneseq  ;;  %vm202_vm0 = vcmask 1043456   ;;  %vm164_vm6 = vcmask 64512   ;;  %vm169_vm8 = vcmask 130048   ;;  %s731_s0 = inlined_call_operand.vmem [shape: bf16[2,16,8], index: 0, kind: input, shape index: {}]   ;;  %s732_s1 = inlined_call_operand.vmem [shape: bf16[24,32], index: 1, kind: input, shape index: {}]   ;;  %s733_s3 = inlined_call_operand.vmem [shape: bf16[96,4], index: 3, kind: input, shape index: {}]   ;;  %s734_s2 = inlined_call_operand.vmem [shape: f32[1,32], index: 2, kind: input, shape index: {}]   ;;  %s735_s4 = inlined_call_operand.vmem [shape: f32[1,4], index: 4, kind: input, shape index: {}]   ;;  %s736_s5 = inlined_call_operand.vmem [shape: f32[2,16,4], index: 5, kind: output, shape index: {}]  }
   0x1   :  { %v462_v1 = vld [vmem:[%s731_s0] sm:$0xff]   ;;  %v469_v2 = vld [vmem:[%s731_s0 + $0x8] sm:$0xff]   ;;  %s559_s0 = smov 8   ;;  %vm195_vm9 = vcmask 195584   ;;  %vm315_vm10 = vcmask 261120   ;;  %vm320_vm11 = vcmask 523264  }
   0x2   :  { %v463_v3 = vunpack.c.l.bf16 %v462_v1  ;;  %v464_v4 = vunpack.c.h.bf16 %v462_v1  ;;  %v467_v5 = vunpack.c.l.bf16 %v469_v2  ;;  %v599_v6 = vshrl.u32 %v21_v0, 7  ;;  %v551_v7 = vld [vmem:[%s732_s1] sm:$0xff]   ;;  %v552_v9 = vld [vmem:[%s732_s1 + $0x8] ss:$0 sps:$4 sm:$0xff]   ;;  %s560_s1 = smov 16  }
   0x3   :  { %v468_v8 = vunpack.c.h.bf16 %v469_v2  ;;  %482 = vmatprep.subr.bf16.mxu0 %v551_v7  ;;  %v204_v38 = vsel %vm202_vm0, %v552_v9, 0  ;;  %vm382_vm12 = vcmask 785408   ;;  %vm438_vm13 = vcmask 31744  }
   0x4   :  { %v83_v10 = vrot.slane %v464_v4, 7  ;;  %v511_v11 = vpack.i.bf16 %v464_v4, %v463_v3  ;;  %v23_v12 = vadd.s32 8, %v599_v6  ;;  %v107_v13 = vrot.slane %v463_v3, 1  ;;  %483 = vmatpush3.bf16.msra.mxu0 %v551_v7  ;;  %v555_v7 = vld [vmem:[%s733_s3 + $0x10] sm:$0xff]  }
   0x5   :  { %v108_v14 = vrot.slane %v464_v4, 1  ;;  %v109_v15 = vrot.slane %v467_v5, 1  ;;  %vm111_vm1 = vcmp.lt.s32.totalorder %v599_v6, 7  ;;  %v516_v17 = vpack.i.bf16 %v468_v8, %v467_v5  ;;  %506 = vmatprep.subr.msk.bf16.mxu0 %vm202_vm0, %v552_v9  ;;  %v553_v4 = vld [vmem:[%s733_s3] sm:$0xff]  }
   0x6   :  { %512 = vrot.lane.b32.xlu0 %v511_v11, %s559_s0  ;;  %v37_v16 = vand.u32 15, %v23_v12  ;;  %v25_v18 = vadd.s32 24, %v599_v6  ;;  %v110_v19 = vrot.slane %v468_v8, 1  ;;  %v82_v20 = vrot.slane %v463_v3, 7  ;;  %490 = vmatprep.subr.bf16.mxu1 %v553_v4  ;;  %v557_v9 = vld [vmem:[%s733_s3 + $0x20] sm:$0xff]  }
   0x7   :  { %v113_v21 = vsel %vm111_vm1, %v108_v14, %v109_v15  ;;  %v114_v22 = vsel %vm111_vm1, %v107_v13, %v108_v14  ;;  %v84_v23 = vrot.slane %v467_v5, 7  ;;  %v85_v29 = vrot.slane %v468_v8, 7  ;;  %v554_v5 = vld [vmem:[%s733_s3 + $0x8] sm:$0xff]   ;;  %491 = vmatpush3.bf16.msra.mxu1 %v553_v4  ;;  %v556_v8 = vld [vmem:[%s733_s3 + $0x18] sm:$0xff]  }
   0x8   :  { %vm615_vm2 = vcmp.lt.s32.totalorder %v37_v16, 15  ;;  %v51_v25 = vand.u32 15, %v25_v18  ;;  %v115_v26 = vsel %vm111_vm1, %v110_v19, %v107_v13  ;;  %v112_v28 = vsel %vm111_vm1, %v109_v15, %v110_v19  ;;  %485 = vmatpush3.bf16.msra.mxu0 %v204_v38  ;;  %492 = vmatprep.subr.bf16.mxu1 %v554_v5  ;;  %v558_v14 = vld [vmem:[%s733_s3 + $0x28] sm:$0xff]   ;;  %s562_s3 = smov 64  }
   0x9   :  { %v129_v27 = vsel %vm615_vm2, %v113_v21, 0.0  ;;  %vm86_vm3 = vcmp.lt.s32.totalorder %v599_v6, 1  ;;  %v24_v39 = vadd.s32 16, %v599_v6  ;;  %v30_v40 = vand.u32 15, %v599_v6 }
   0xa   :  { %v521_v30 = vpack.i.bf16 %v129_v27, %v114_v22  ;;  %517 = vrot.lane.b32.xlu0 %v516_v17, %s559_s0  ;;  %vm626_vm4 = vcmp.lt.s32.totalorder %v51_v25, 15  ;;  %v88_v32 = vsel %vm86_vm3, %v83_v10, %v84_v23  ;;  %v87_v34 = vsel %vm86_vm3, %v84_v23, %v85_v29 }
   0xb   :  { %v131_v33 = vsel %vm626_vm4, %v115_v26, 0.0  ;;  %v89_v35 = vsel %vm86_vm3, %v82_v20, %v83_v10  ;;  %v90_v37 = vsel %vm86_vm3, %v85_v29, %v82_v20  ;;  %v44_v42 = vand.u32 15, %v24_v39  ;;  %493 = vmatpush3.bf16.msra.mxu1 %v554_v5  ;;  %v447_v10 = vld [vmem:[%s734_s2] ss:$0 sm:$0xff]  ;;  %s561_s2 = smov 32  }
   0xc   :  { %522 = vrot.lane.b32.xlu1 %v521_v30, %s560_s1  ;;  %v526_v36 = vpack.i.bf16 %v131_v33, %v112_v28  ;;  %vm643_vm5 = vcmp.ge.s32.totalorder %v30_v40, 1  ;;  %494 = vmatprep.subr.bf16.mxu1 %v555_v7  ;;  %v452_v5 = vld [vmem:[%s735_s4] ss:$0 sm:$0xff] }
   0xd   :  { %v103_v46 = vsel %vm643_vm5, %v90_v37, 0.0  ;;  %vm649_vm7 = vcmp.ge.s32.totalorder %v44_v42, 1 }
   0xe   :  { %v105_v56 = vsel %vm649_vm7, %v88_v32, 0.0 }
   0xf   :  { %495 = vmatpush3.bf16.msra.mxu1 %v555_v7 }
  0x10   :  { %527 = vrot.lane.b32.xlu1 %v526_v36, %s560_s1  ;;  %496 = vmatprep.subr.bf16.mxu1 %v556_v8 }
  0x13   :  { %497 = vmatpush3.bf16.msra.mxu1 %v556_v8 }
  0x14   :  { %498 = vmatprep.subr.bf16.mxu1 %v557_v9 }
  0x17   :  { %499 = vmatpush3.bf16.msra.mxu1 %v557_v9 }
  0x18   :  { %500 = vmatprep.subr.bf16.mxu1 %v558_v14 }
  0x1b   :  { %501 = vmatpush3.bf16.msra.mxu1 %v558_v14 }
  0x78   :  { %v513_v41 = vpop.permute.xlu0 %512 }
  0x79   :  { %v515_v44 = vunpack.i.h.bf16 %v513_v41  ;;  %v514_v45 = vunpack.i.l.bf16 %v513_v41 }
  0x7b   :  { %v165_v52 = vsel %vm164_vm6, %v103_v46, %v514_v45  ;;  %v166_v53 = vsel %vm164_vm6, %v89_v35, %v515_v44 }
  0x7c   :  { %v518_v48 = vpop.permute.xlu0 %517 }
  0x7d   :  { %v520_v50 = vunpack.i.h.bf16 %v518_v48  ;;  %v519_v51 = vunpack.i.l.bf16 %v518_v48 }
  0x7e   :  { %v523_v49 = vpop.permute.xlu1 %522 }
  0x7f   :  { %v525_v54 = vunpack.i.h.bf16 %v523_v49  ;;  %v524_v55 = vunpack.i.l.bf16 %v523_v49  ;;  %v168_v59 = vsel %vm164_vm6, %v87_v34, %v520_v50  ;;  %v167_v60 = vsel %vm164_vm6, %v105_v56, %v519_v51 }
  0x81   :  { %v170_v57 = vsel %vm169_vm8, %v165_v52, %v524_v55  ;;  %v171_v58 = vsel %vm169_vm8, %v166_v53, %v525_v54 }
  0x82   :  { %v528_v61 = vpop.permute.xlu1 %527  ;;  %v174_v62 = vpack.c.bf16 %v171_v58, %v170_v57 }
  0x83   :  { %v530_v63 = vunpack.i.h.bf16 %v528_v61  ;;  %v529_v0 = vunpack.i.l.bf16 %v528_v61 }
  0x84   :  { %486 = vmatprep.mubr.msk.bf16.mxu0 %vm195_vm9, %v174_v62 }
  0x85   :  { %v173_v1 = vsel %vm169_vm8, %v168_v59, %v530_v63  ;;  %v172_v2 = vsel %vm169_vm8, %v167_v60, %v529_v0 }
  0x86   :  { %v175_v3 = vpack.c.bf16 %v173_v1, %v172_v2 }
  0x88   :  { %487 = vmatmul.mubr.msk.bf16.vlgmr.msra.gmra.mrb[0].mxu0 %vm195_vm9, %v175_v3 }
 0x15b   :  { %v488_v11 = vpop.f32.mrb[0].mxu0 }
 0x15c   :  { %v249_v12 = vadd.f32 %v488_v11, %v447_v10  ;;  %v240_v13 = vpop.f32.mrb[1].mxu0 }
 0x15d   :  { %v241_v15 = vadd.f32 %v447_v10, %v240_v13  ;;  %v489_v16 = vpop.f32.mrb[2].mxu0 }
 0x15e   :  { %v257_v17 = vmax.f32 %v249_v12, 0.0  ;;  %v252_v18 = vadd.f32 %v489_v16, %v447_v10  ;;  %v243_v19 = vpop.f32.mrb[3].mxu0 }
 0x15f   :  { %v255_v20 = vmax.f32 %v241_v15, 0.0  ;;  %v244_v21 = vadd.f32 %v447_v10, %v243_v19 }
 0x160   :  { %v258_v22 = vmax.f32 %v252_v18, 0.0  ;;  %v261_v23 = vrot.slane %v257_v17, 7  ;;  %v273_v28 = vrot.slane %v257_v17, 1 }
 0x161   :  { %v259_v25 = vrot.slane %v255_v20, 7  ;;  %v271_v26 = vrot.slane %v255_v20, 1  ;;  %v256_v27 = vmax.f32 %v244_v21, 0.0 }
 0x162   :  { %v262_v29 = vrot.slane %v258_v22, 7  ;;  %v274_v30 = vrot.slane %v258_v22, 1  ;;  %v531_v32 = vpack.i.bf16 %v258_v22, %v257_v17 }
 0x163   :  { %v260_v33 = vrot.slane %v256_v27, 7  ;;  %v272_v34 = vrot.slane %v256_v27, 1  ;;  %v536_v35 = vpack.i.bf16 %v256_v27, %v255_v20 }
 0x164   :  { %532 = vrot.lane.b32.xlu1 %v531_v32, %s561_s2  ;;  %v275_v36 = vsel %vm111_vm1, %v273_v28, %v274_v30  ;;  %v278_v37 = vsel %vm111_vm1, %v274_v30, %v271_v26  ;;  %v263_v38 = vsel %vm86_vm3, %v261_v23, %v262_v29  ;;  %v266_v39 = vsel %vm86_vm3, %v262_v29, %v259_v25 }
 0x165   :  { %537 = vrot.lane.b32.xlu0 %v536_v35, %s561_s2  ;;  %v282_v40 = vsel %vm626_vm4, %v278_v37, 0.0  ;;  %v276_v41 = vsel %vm111_vm1, %v272_v34, %v273_v28  ;;  %v277_v42 = vsel %vm111_vm1, %v271_v26, %v272_v34  ;;  %v264_v44 = vsel %vm86_vm3, %v260_v33, %v261_v23 }
 0x166   :  { %v546_v45 = vpack.i.bf16 %v282_v40, %v275_v36  ;;  %v280_v46 = vsel %vm615_vm2, %v276_v41, 0.0  ;;  %v265_v48 = vsel %vm86_vm3, %v259_v25, %v260_v33  ;;  %v269_v24 = vsel %vm649_vm7, %v264_v44, 0.0 }
 0x167   :  { %v541_v49 = vpack.i.bf16 %v280_v46, %v277_v42  ;;  %v267_v58 = vsel %vm643_vm5, %v266_v39, 0.0 }
 0x168   :  { %547 = vrot.lane.b32.xlu1 %v546_v45, %s562_s3 }
 0x169   :  { %542 = vrot.lane.b32.xlu0 %v541_v49, %s562_s3 }
 0x1d6   :  { %v533_v31 = vpop.permute.xlu1 %532 }
 0x1d7   :  { %v538_v50 = vpop.permute.xlu0 %537  ;;  %v535_v51 = vunpack.i.h.bf16 %v533_v31  ;;  %v534_v52 = vunpack.i.l.bf16 %v533_v31 }
 0x1d8   :  { %v540_v53 = vunpack.i.h.bf16 %v538_v50  ;;  %v539_v54 = vunpack.i.l.bf16 %v538_v50 }
 0x1d9   :  { %v318_v59 = vsel %vm315_vm10, %v269_v24, %v534_v52  ;;  %v319_v60 = vsel %vm315_vm10, %v263_v38, %v535_v51 }
 0x1da   :  { %v548_v55 = vpop.permute.xlu1 %547  ;;  %v316_v1 = vsel %vm315_vm10, %v267_v58, %v539_v54  ;;  %v317_v47 = vsel %vm315_vm10, %v265_v48, %v540_v53 }
 0x1db   :  { %v550_v56 = vunpack.i.h.bf16 %v548_v55  ;;  %v549_v57 = vunpack.i.l.bf16 %v548_v55  ;;  %v543_v6 = vpop.permute.xlu0 %542 }
 0x1dc   :  { %v545_v61 = vunpack.i.h.bf16 %v543_v6  ;;  %v544_v62 = vunpack.i.l.bf16 %v543_v6 }
 0x1dd   :  { %v324_v63 = vsel %vm320_vm11, %v319_v60, %v550_v56  ;;  %v323_v0 = vsel %vm320_vm11, %v318_v59, %v549_v57 }
 0x1de   :  { %v326_v2 = vpack.c.bf16 %v324_v63, %v323_v0  ;;  %v321_v3 = vsel %vm320_vm11, %v316_v1, %v544_v62  ;;  %v322_v43 = vsel %vm320_vm11, %v317_v47, %v545_v61 }
 0x1df   :  { %v325_v4 = vpack.c.bf16 %v322_v43, %v321_v3 }
 0x1e1   :  { %502 = vmatprep.mubr.msk.bf16.mxu1 %vm382_vm12, %v325_v4 }
 0x1e2   :  { %503 = vmatmul.mubr.msk.bf16.vlgmr.msra.gmra.mrb[0].mxu1 %vm382_vm12, %v326_v2 }
 0x2b5   :  { %v504_v7 = vpop.f32.mrb[0].mxu1 }
 0x2b6   :  { %v432_v8 = vadd.f32 %v504_v7, %v452_v5  ;;  %v423_v9 = vpop.f32.mrb[1].mxu1 }
 0x2b7   :  { %v424_v10 = vadd.f32 %v452_v5, %v423_v9  ;;  %v505_v11 = vpop.f32.mrb[2].mxu1 }
 0x2b8   :  { %441 = vst.msk [vmem:[%s736_s5 + $0x10] sm:$0xff] %vm438_vm13, %v432_v8  ;;  %v435_v12 = vadd.f32 %v505_v11, %v452_v5  ;;  %v426_v13 = vpop.f32.mrb[3].mxu1 }
 0x2b9   :  { %439 = vst.msk [vmem:[%s736_s5] sm:$0xff] %vm438_vm13, %v424_v10  ;;  %v427_v14 = vadd.f32 %v452_v5, %v426_v13 }
 0x2ba   :  { %442 = vst.msk [vmem:[%s736_s5 + $0x18] sm:$0xff] %vm438_vm13, %v435_v12 }
 0x2bb   :  { %440 = vst.msk [vmem:[%s736_s5 + $0x8] sm:$0xff] %vm438_vm13, %v427_v14 }

</bundles_post_ra>
